<compile_context>
chip_gen: v6e
topology: v6e:2x2x1
jax: 0.10.0
libtpu: 0.0.40
codegen_flags: <defaults>
</compile_context>

<pallas_src>
import jax
import jax.numpy as jnp
from jax.experimental import pallas as pl
from jax.experimental.pallas import tpu as pltpu

NUM_LAYERS = 3       # num_layers in the PyTorch module
EMB_DIM = 32         # emb_dim == mlp_dim (small synthetic size; original = 300)
MBTR_DIM = 35        # mol_attr is reshaped to (-1, 35)
LANES = 128          # fused activation input width: [x_gin | mol_attr | zeros]
HEAD_LANES = 128     # lane-dense width of the final Linear(E, 1) weight (MXU)
HEAD_COLS = 8        # lanes actually written to HBM for the head output
MAX_TILE = 1024      # batch-tile cap
BATCH = 8


# --------------------------------------------------------------------------
# Kernel
# --------------------------------------------------------------------------
def subgraph_model_kernel(act_ref, wbig_ref, wsmall_ref, b_ref, wf_ref, bf_ref,
                          out_ref):
    """x2 = MLP(y); h = last_hidden(x_gin, x2); out = head(h).

    BN is pre-folded into the weights.  `act_ref` is the fused (tb, 128) bf16
    activation input: lanes [0:32) = x_gin, lanes [32:67) = mol_attr, rest 0.
    Matmuls run with bf16 operands / f32 accumulation; epilogues stay in f32.
    """
    fused = act_ref[...]                                         # (tb, 128) bf16

    def dense_relu(h_f32, w_slot, b_slot):
        z = jnp.dot(h_f32.astype(jnp.bfloat16), wsmall_ref[w_slot],
                    preferred_element_type=jnp.float32)
        return jnp.maximum(z + b_ref[b_slot:b_slot + 1, :], 0.0)

    # ---- MLP branch (weight rows outside the mol_attr lanes are zero) ------
    z = jnp.dot(fused, wbig_ref[0], preferred_element_type=jnp.float32)
    x2 = jnp.maximum(z + b_ref[0:1, :], 0.0)
    x2 = dense_relu(x2, 0, 1)
    x2 = dense_relu(x2, 1, 2)

    # ---- `last` layer 0: concat(x_gin, x2) @ W  ==  split-K dots summed ----
    z = (jnp.dot(fused, wbig_ref[1], preferred_element_type=jnp.float32)
         + jnp.dot(x2.astype(jnp.bfloat16), wsmall_ref[2],
                   preferred_element_type=jnp.float32)
         + b_ref[3:4, :])
    h = jnp.maximum(z, 0.0)
    h = dense_relu(h, 3, 4)
    h = dense_relu(h, 4, 5)

    # ---- final Linear(E, 1): lane-dense dot, only 8 lanes stored to HBM ----
    pred = jnp.dot(h.astype(jnp.bfloat16), wf_ref[...],
                   preferred_element_type=jnp.float32)           # (tb, 128) f32
    out_ref[...] = pred[:, :HEAD_COLS] + bf_ref[...]             # (tb, 8)


# --------------------------------------------------------------------------
# Wrapper
# --------------------------------------------------------------------------
def _round_up(x, m):
    return ((x + m - 1) // m) * m


def _pick_batch_tile(batch):
    """Batch tile + padded batch.  For B > 16 guarantee >= 2 grid steps so the
    'parallel' axis can shard across both TensorCores on v7x, keep the tile
    sublane-aligned, and cap it (per-step fixed cost ~0.35 us)."""
    if batch <= 16:
        return batch, batch
    tb = min(MAX_TILE, _round_up(pl.cdiv(batch, 2), 8))
    return tb, _round_up(batch, tb)


def subgraph_model_forward(x_gin, y_mbtr, packed):
    wbig, wsmall, b_stack, wf_pad, bf_pad = packed
    batch = x_gin.shape[0]
    if y_mbtr.shape[0] != batch:
        raise ValueError("mol_attr.reshape(-1, 35) row count must match the "
                         "graph-embedding batch size")

    # Fused lane-dense bf16 activation input: [x_gin | mol_attr | zero lanes].
    fused = jnp.concatenate(
        [x_gin.astype(jnp.bfloat16),
         y_mbtr.astype(jnp.bfloat16),
         jnp.zeros((batch, LANES - EMB_DIM - MBTR_DIM), jnp.bfloat16)], axis=1)

    tb, batch_pad = _pick_batch_tile(batch)
    if batch_pad != batch:
        fused = jnp.pad(fused, ((0, batch_pad - batch), (0, 0)))
    grid = (batch_pad // tb,)

    out = pl.pallas_call(
        subgraph_model_kernel,
        out_shape=jax.ShapeDtypeStruct((batch_pad, HEAD_COLS), jnp.float32),
        grid=grid,
        in_specs=[
            pl.BlockSpec((tb, LANES), lambda i: (i, 0)),       # fused activations
            # Constant-index weight/bias blocks (Mosaic skips re-DMA on
            # revisit).  At production size single-buffer these
            # (pl.Buffered(1) / whole-array VMEM residency) for VMEM headroom.
            pl.BlockSpec(wbig.shape, lambda i: (0, 0, 0)),     # (2, 128, E) bf16
            pl.BlockSpec(wsmall.shape, lambda i: (0, 0, 0)),   # (5, E, E)   bf16
            pl.BlockSpec(b_stack.shape, lambda i: (0, 0)),     # (6, E)      f32
            pl.BlockSpec(wf_pad.shape, lambda i: (0, 0)),      # (E, 128)    bf16
            pl.BlockSpec(bf_pad.shape, lambda i: (0, 0)),      # (1, 8)      f32
        ],
        out_specs=pl.BlockSpec((tb, HEAD_COLS), lambda i: (i, 0)),
        compiler_params=pltpu.CompilerParams(
            dimension_semantics=("parallel",),
            # Re-derive against 64 MiB physical VMEM (v7x) when scaling
            # tb / emb_dim to the production configuration.
            vmem_limit_bytes=32 * 1024 * 1024),
    )(fused, wbig, wsmall, b_stack, wf_pad, bf_pad)

    return out[:batch, :1]   # lane 0 of the 8-lane padded head output


# --------------------------------------------------------------------------
# Parameters: synthetic PyTorch-equivalent init, then BN-fold + bf16 pack
# --------------------------------------------------------------------------
def _fold_bn(w, b, gamma, beta, mean, var, eps=1e-5):
    scale = gamma / jnp.sqrt(var + eps)
    return w * scale[None, :], b * scale + (beta - mean * scale)


def init_raw_params(key):
    """Deterministic synthetic parameters matching the module's __init__ shapes."""
    def linear(k, fan_in, fan_out):
        k1, k2 = jax.random.split(k)
        bound = 1.0 / jnp.sqrt(jnp.float32(fan_in))
        w = jax.random.uniform(k1, (fan_in, fan_out), jnp.float32, -bound, bound)
        b = jax.random.uniform(k2, (fan_out,), jnp.float32, -bound, bound)
        return w, b

    def bn(k, dim):
        k1, k2, k3 = jax.random.split(k, 3)
        gamma = 1.0 + 0.1 * jax.random.normal(k1, (dim,), jnp.float32)
        beta = 0.1 * jax.random.normal(k2, (dim,), jnp.float32)
        mean = 0.05 * jax.random.normal(k3, (dim,), jnp.float32)
        var = jnp.ones((dim,), jnp.float32)
        return gamma, beta, mean, var

    keys = iter(jax.random.split(key, 32))
    dims = [(MBTR_DIM, EMB_DIM), (EMB_DIM, EMB_DIM), (EMB_DIM, EMB_DIM),      # MLP
            (2 * EMB_DIM, EMB_DIM), (EMB_DIM, EMB_DIM), (EMB_DIM, EMB_DIM)]   # `last`
    layers = []
    for fan_in, fan_out in dims:
        w, b = linear(next(keys), fan_in, fan_out)
        g, be, mu, var = bn(next(keys), fan_out)
        layers.append((w, b, g, be, mu, var))
    wf, bf = linear(next(keys), EMB_DIM, 1)   # final Linear(E, 1)
    return layers, (wf, bf)


def pack_params(layers, head):
    """Fold BN into the Linears, cast weights to bf16, pack into 5 aligned arrays."""
    folded = [_fold_bn(*p) for p in layers]
    (w0, b0), (w1, b1), (w2, b2), (w3, b3), (w4, b4), (w5, b5) = folded

    # (2, 128, E): slot 0 = MLP layer 0 (acts on the mol_attr lanes of `fused`),
    #              slot 1 = `last` layer 0, x_gin half of the concat weight.
    wbig = jnp.zeros((2, LANES, EMB_DIM), jnp.float32)
    wbig = wbig.at[0, EMB_DIM:EMB_DIM + MBTR_DIM, :].set(w0)
    wbig = wbig.at[1, :EMB_DIM, :].set(w3[:EMB_DIM])
    wbig = wbig.astype(jnp.bfloat16)

    # (5, E, E): MLP layers 1..2, `last` layer 0 (x2 half), `last` layers 1..2.
    wsmall = jnp.stack([w1, w2, w3[EMB_DIM:], w4, w5]).astype(jnp.bfloat16)

    # (6, E) f32 biases — epilogues stay in f32.
    b_stack = jnp.stack([b0, b1, b2, b3, b4, b5]).astype(jnp.float32)

    wf, bf = head
    wf_pad = (jnp.zeros((EMB_DIM, HEAD_LANES), jnp.float32)
              .at[:, :1].set(wf).astype(jnp.bfloat16))
    bf_pad = jnp.zeros((1, HEAD_COLS), jnp.float32).at[0, 0].set(bf[0])
    return wbig, wsmall, b_stack, wf_pad, bf_pad


def reference_forward(x_gin, y_mbtr, layers, head):
    """Pure-JAX reference of the module forward (eval-mode BN, dropout=0) at the
    kernel's numerical precision: bf16 matmul operands, f32 accumulation."""
    folded = [_fold_bn(*p) for p in layers]

    def dense(h, w, b, relu=True):
        z = jnp.dot(h.astype(jnp.bfloat16), w.astype(jnp.bfloat16),
                    preferred_element_type=jnp.float32) + b
        return jnp.maximum(z, 0.0) if relu else z

    h2 = y_mbtr.astype(jnp.float32)
    for w, b in folded[:3]:
        h2 = dense(h2, w, b)
    h = jnp.concatenate([x_gin.astype(jnp.float32), h2], axis=1)
    for w, b in folded[3:]:
        h = dense(h, w, b)
    wf, bf = head
    return dense(h, wf, bf, relu=False)


# --------------------------------------------------------------------------
if __name__ == "__main__":
    key = jax.random.PRNGKey(0)
    k_p, k_x, k_y = jax.random.split(key, 3)

    layers, head = init_raw_params(k_p)
    packed = pack_params(layers, head)

    # GIN graph-embedding surrogate input (see TODO(synk) above).
    x_gin = jax.random.normal(k_x, (BATCH, EMB_DIM), jnp.float32)

    # batched_data['mol_attr'] -> reshape(-1, 35)
    mol_attr = jax.random.normal(k_y, (BATCH, MBTR_DIM), jnp.float32)
    y_mbtr = mol_attr.reshape(-1, MBTR_DIM)

    out = subgraph_model_forward(x_gin, y_mbtr, packed)
    jax.block_until_ready(out)

    ref = reference_forward(x_gin, y_mbtr, layers, head)
    assert out.shape == (BATCH, 1) and out.dtype == jnp.float32
    assert jnp.allclose(out, ref, atol=2e-3, rtol=2e-3), float(
        jnp.max(jnp.abs(out - ref)))
    print("KERNEL_OK")
</pallas_src>

<mosaic_0001>
module attributes {stable_mosaic.version = 11 : i64} {
  func.func @subgraph_model_kernel(%arg0: i32, %arg1: memref<8x128xbf16, #tpu.memory_space<vmem>>, %arg2: memref<2x128x32xbf16, #tpu.memory_space<vmem>>, %arg3: memref<5x32x32xbf16, #tpu.memory_space<vmem>>, %arg4: memref<6x32xf32, #tpu.memory_space<vmem>>, %arg5: memref<32x128xbf16, #tpu.memory_space<vmem>>, %arg6: memref<1x8xf32, #tpu.memory_space<vmem>>, %arg7: memref<8x8xf32, #tpu.memory_space<vmem>>) attributes {dimension_semantics = [#tpu.dimension_semantics<parallel>], iteration_bounds = array<i64: 1>, scalar_prefetch = 0 : i64, scratch_operands = 0 : i64, tpu.core_type = #tpu.core_type<tc>, window_params = [{transform_indices = @transform_0, window_bounds = array<i64: 8, 128>}, {pipeline_mode = #tpu.pipeline_mode<synchronous>, transform_indices = @transform_1, window_bounds = array<i64: 2, 128, 32>}, {pipeline_mode = #tpu.pipeline_mode<synchronous>, transform_indices = @transform_2, window_bounds = array<i64: 5, 32, 32>}, {pipeline_mode = #tpu.pipeline_mode<synchronous>, transform_indices = @transform_3, window_bounds = array<i64: 6, 32>}, {pipeline_mode = #tpu.pipeline_mode<synchronous>, transform_indices = @transform_4, window_bounds = array<i64: 32, 128>}, {pipeline_mode = #tpu.pipeline_mode<synchronous>, transform_indices = @transform_5, window_bounds = array<i64: 1, 8>}, {transform_indices = @transform_6, window_bounds = array<i64: 8, 8>}]} {
    %c0 = arith.constant 0 : index
    %c0_0 = arith.constant 0 : index
    %0 = vector.load %arg1[%c0, %c0_0] : memref<8x128xbf16, #tpu.memory_space<vmem>>, vector<8x128xbf16>
    %c0_1 = arith.constant 0 : index
    %c0_2 = arith.constant 0 : index
    %c0_3 = arith.constant 0 : index
    %1 = vector.load %arg2[%c0_1, %c0_2, %c0_3] : memref<2x128x32xbf16, #tpu.memory_space<vmem>>, vector<1x128x32xbf16>
    %2 = vector.shape_cast %1 : vector<1x128x32xbf16> to vector<128x32xbf16>
    %cst = arith.constant dense<0.000000e+00> : vector<8x32xf32>
    %3 = tpu.matmul %0, %2, %cst {dimension_numbers = #tpu.dot_dimension_numbers<[1], [0], [0], [1], [0, 0, 1, 1], [], []>} : vector<8x128xbf16>, vector<128x32xbf16>, vector<8x32xf32> -> vector<8x32xf32>
    %c0_4 = arith.constant 0 : index
    %c0_5 = arith.constant 0 : index
    %4 = vector.load %arg4[%c0_4, %c0_5] : memref<6x32xf32, #tpu.memory_space<vmem>>, vector<1x32xf32>
    %5 = vector.broadcast %4 : vector<1x32xf32> to vector<8x32xf32>
    %6 = arith.addf %3, %5 : vector<8x32xf32>
    %cst_6 = arith.constant 0.000000e+00 : f32
    %7 = vector.broadcast %cst_6 : f32 to vector<8x32xf32>
    %8 = arith.maximumf %6, %7 : vector<8x32xf32>
    %9 = arith.truncf %8 : vector<8x32xf32> to vector<8x32xbf16>
    %c0_7 = arith.constant 0 : index
    %c0_8 = arith.constant 0 : index
    %c0_9 = arith.constant 0 : index
    %10 = vector.load %arg3[%c0_7, %c0_8, %c0_9] : memref<5x32x32xbf16, #tpu.memory_space<vmem>>, vector<1x32x32xbf16>
    %11 = vector.shape_cast %10 : vector<1x32x32xbf16> to vector<32x32xbf16>
    %cst_10 = arith.constant dense<0.000000e+00> : vector<8x32xf32>
    %12 = tpu.matmul %9, %11, %cst_10 {dimension_numbers = #tpu.dot_dimension_numbers<[1], [0], [0], [1], [0, 0, 1, 1], [], []>} : vector<8x32xbf16>, vector<32x32xbf16>, vector<8x32xf32> -> vector<8x32xf32>
    %c1 = arith.constant 1 : index
    %c0_11 = arith.constant 0 : index
    %13 = vector.load %arg4[%c1, %c0_11] : memref<6x32xf32, #tpu.memory_space<vmem>>, vector<1x32xf32>
    %14 = vector.broadcast %13 : vector<1x32xf32> to vector<8x32xf32>
    %15 = arith.addf %12, %14 : vector<8x32xf32>
    %cst_12 = arith.constant 0.000000e+00 : f32
    %16 = vector.broadcast %cst_12 : f32 to vector<8x32xf32>
    %17 = arith.maximumf %15, %16 : vector<8x32xf32>
    %18 = arith.truncf %17 : vector<8x32xf32> to vector<8x32xbf16>
    %c1_13 = arith.constant 1 : index
    %c0_14 = arith.constant 0 : index
    %c0_15 = arith.constant 0 : index
    %19 = vector.load %arg3[%c1_13, %c0_14, %c0_15] : memref<5x32x32xbf16, #tpu.memory_space<vmem>>, vector<1x32x32xbf16>
    %20 = vector.shape_cast %19 : vector<1x32x32xbf16> to vector<32x32xbf16>
    %cst_16 = arith.constant dense<0.000000e+00> : vector<8x32xf32>
    %21 = tpu.matmul %18, %20, %cst_16 {dimension_numbers = #tpu.dot_dimension_numbers<[1], [0], [0], [1], [0, 0, 1, 1], [], []>} : vector<8x32xbf16>, vector<32x32xbf16>, vector<8x32xf32> -> vector<8x32xf32>
    %c2 = arith.constant 2 : index
    %c0_17 = arith.constant 0 : index
    %22 = vector.load %arg4[%c2, %c0_17] : memref<6x32xf32, #tpu.memory_space<vmem>>, vector<1x32xf32>
    %23 = vector.broadcast %22 : vector<1x32xf32> to vector<8x32xf32>
    %24 = arith.addf %21, %23 : vector<8x32xf32>
    %cst_18 = arith.constant 0.000000e+00 : f32
    %25 = vector.broadcast %cst_18 : f32 to vector<8x32xf32>
    %26 = arith.maximumf %24, %25 : vector<8x32xf32>
    %c1_19 = arith.constant 1 : index
    %c0_20 = arith.constant 0 : index
    %c0_21 = arith.constant 0 : index
    %27 = vector.load %arg2[%c1_19, %c0_20, %c0_21] : memref<2x128x32xbf16, #tpu.memory_space<vmem>>, vector<1x128x32xbf16>
    %28 = vector.shape_cast %27 : vector<1x128x32xbf16> to vector<128x32xbf16>
    %cst_22 = arith.constant dense<0.000000e+00> : vector<8x32xf32>
    %29 = tpu.matmul %0, %28, %cst_22 {dimension_numbers = #tpu.dot_dimension_numbers<[1], [0], [0], [1], [0, 0, 1, 1], [], []>} : vector<8x128xbf16>, vector<128x32xbf16>, vector<8x32xf32> -> vector<8x32xf32>
    %30 = arith.truncf %26 : vector<8x32xf32> to vector<8x32xbf16>
    %c2_23 = arith.constant 2 : index
    %c0_24 = arith.constant 0 : index
    %c0_25 = arith.constant 0 : index
    %31 = vector.load %arg3[%c2_23, %c0_24, %c0_25] : memref<5x32x32xbf16, #tpu.memory_space<vmem>>, vector<1x32x32xbf16>
    %32 = vector.shape_cast %31 : vector<1x32x32xbf16> to vector<32x32xbf16>
    %cst_26 = arith.constant dense<0.000000e+00> : vector<8x32xf32>
    %33 = tpu.matmul %30, %32, %cst_26 {dimension_numbers = #tpu.dot_dimension_numbers<[1], [0], [0], [1], [0, 0, 1, 1], [], []>} : vector<8x32xbf16>, vector<32x32xbf16>, vector<8x32xf32> -> vector<8x32xf32>
    %34 = arith.addf %29, %33 : vector<8x32xf32>
    %c3 = arith.constant 3 : index
    %c0_27 = arith.constant 0 : index
    %35 = vector.load %arg4[%c3, %c0_27] : memref<6x32xf32, #tpu.memory_space<vmem>>, vector<1x32xf32>
    %36 = vector.broadcast %35 : vector<1x32xf32> to vector<8x32xf32>
    %37 = arith.addf %34, %36 : vector<8x32xf32>
    %cst_28 = arith.constant 0.000000e+00 : f32
    %38 = vector.broadcast %cst_28 : f32 to vector<8x32xf32>
    %39 = arith.maximumf %37, %38 : vector<8x32xf32>
    %40 = arith.truncf %39 : vector<8x32xf32> to vector<8x32xbf16>
    %c3_29 = arith.constant 3 : index
    %c0_30 = arith.constant 0 : index
    %c0_31 = arith.constant 0 : index
    %41 = vector.load %arg3[%c3_29, %c0_30, %c0_31] : memref<5x32x32xbf16, #tpu.memory_space<vmem>>, vector<1x32x32xbf16>
    %42 = vector.shape_cast %41 : vector<1x32x32xbf16> to vector<32x32xbf16>
    %cst_32 = arith.constant dense<0.000000e+00> : vector<8x32xf32>
    %43 = tpu.matmul %40, %42, %cst_32 {dimension_numbers = #tpu.dot_dimension_numbers<[1], [0], [0], [1], [0, 0, 1, 1], [], []>} : vector<8x32xbf16>, vector<32x32xbf16>, vector<8x32xf32> -> vector<8x32xf32>
    %c4 = arith.constant 4 : index
    %c0_33 = arith.constant 0 : index
    %44 = vector.load %arg4[%c4, %c0_33] : memref<6x32xf32, #tpu.memory_space<vmem>>, vector<1x32xf32>
    %45 = vector.broadcast %44 : vector<1x32xf32> to vector<8x32xf32>
    %46 = arith.addf %43, %45 : vector<8x32xf32>
    %cst_34 = arith.constant 0.000000e+00 : f32
    %47 = vector.broadcast %cst_34 : f32 to vector<8x32xf32>
    %48 = arith.maximumf %46, %47 : vector<8x32xf32>
    %49 = arith.truncf %48 : vector<8x32xf32> to vector<8x32xbf16>
    %c4_35 = arith.constant 4 : index
    %c0_36 = arith.constant 0 : index
    %c0_37 = arith.constant 0 : index
    %50 = vector.load %arg3[%c4_35, %c0_36, %c0_37] : memref<5x32x32xbf16, #tpu.memory_space<vmem>>, vector<1x32x32xbf16>
    %51 = vector.shape_cast %50 : vector<1x32x32xbf16> to vector<32x32xbf16>
    %cst_38 = arith.constant dense<0.000000e+00> : vector<8x32xf32>
    %52 = tpu.matmul %49, %51, %cst_38 {dimension_numbers = #tpu.dot_dimension_numbers<[1], [0], [0], [1], [0, 0, 1, 1], [], []>} : vector<8x32xbf16>, vector<32x32xbf16>, vector<8x32xf32> -> vector<8x32xf32>
    %c5 = arith.constant 5 : index
    %c0_39 = arith.constant 0 : index
    %53 = vector.load %arg4[%c5, %c0_39] : memref<6x32xf32, #tpu.memory_space<vmem>>, vector<1x32xf32>
    %54 = vector.broadcast %53 : vector<1x32xf32> to vector<8x32xf32>
    %55 = arith.addf %52, %54 : vector<8x32xf32>
    %cst_40 = arith.constant 0.000000e+00 : f32
    %56 = vector.broadcast %cst_40 : f32 to vector<8x32xf32>
    %57 = arith.maximumf %55, %56 : vector<8x32xf32>
    %58 = arith.truncf %57 : vector<8x32xf32> to vector<8x32xbf16>
    %c0_41 = arith.constant 0 : index
    %c0_42 = arith.constant 0 : index
    %59 = vector.load %arg5[%c0_41, %c0_42] : memref<32x128xbf16, #tpu.memory_space<vmem>>, vector<32x128xbf16>
    %cst_43 = arith.constant dense<0.000000e+00> : vector<8x128xf32>
    %60 = tpu.matmul %58, %59, %cst_43 {dimension_numbers = #tpu.dot_dimension_numbers<[1], [0], [0], [1], [0, 0, 1, 1], [], []>} : vector<8x32xbf16>, vector<32x128xbf16>, vector<8x128xf32> -> vector<8x128xf32>
    %61 = vector.extract_strided_slice %60 {offsets = [0, 0], sizes = [8, 8], strides = [1, 1]} : vector<8x128xf32> to vector<8x8xf32>
    %c0_44 = arith.constant 0 : index
    %c0_45 = arith.constant 0 : index
    %62 = vector.load %arg6[%c0_44, %c0_45] : memref<1x8xf32, #tpu.memory_space<vmem>>, vector<1x8xf32>
    %63 = vector.broadcast %62 : vector<1x8xf32> to vector<8x8xf32>
    %64 = arith.addf %61, %63 : vector<8x8xf32>
    %c0_46 = arith.constant 0 : index
    %c0_47 = arith.constant 0 : index
    %65 = vector.load %arg7[%c0_46, %c0_47] : memref<8x8xf32, #tpu.memory_space<vmem>>, vector<8x8xf32>
    tpu.vector_store %arg7[%c0_46, %c0_47], %64 {strides = array<i32>} : memref<8x8xf32, #tpu.memory_space<vmem>>, vector<8x8xf32>,
    return
  }
  func.func @transform_0(%arg0: i32) -> (i32, i32) {
    %c0_i32 = arith.constant 0 : i32
    %c0_i32_0 = arith.constant 0 : i32
    return %arg0, %c0_i32 : i32, i32
  }
  func.func @transform_1(%arg0: i32) -> (i32, i32, i32) {
    %c0_i32 = arith.constant 0 : i32
    %c0_i32_0 = arith.constant 0 : i32
    %c0_i32_1 = arith.constant 0 : i32
    %c0_i32_2 = arith.constant 0 : i32
    return %c0_i32, %c0_i32_0, %c0_i32_1 : i32, i32, i32
  }
  func.func @transform_2(%arg0: i32) -> (i32, i32, i32) {
    %c0_i32 = arith.constant 0 : i32
    %c0_i32_0 = arith.constant 0 : i32
    %c0_i32_1 = arith.constant 0 : i32
    %c0_i32_2 = arith.constant 0 : i32
    return %c0_i32, %c0_i32_0, %c0_i32_1 : i32, i32, i32
  }
  func.func @transform_3(%arg0: i32) -> (i32, i32) {
    %c0_i32 = arith.constant 0 : i32
    %c0_i32_0 = arith.constant 0 : i32
    %c0_i32_1 = arith.constant 0 : i32
    return %c0_i32, %c0_i32_0 : i32, i32
  }
  func.func @transform_4(%arg0: i32) -> (i32, i32) {
    %c0_i32 = arith.constant 0 : i32
    %c0_i32_0 = arith.constant 0 : i32
    %c0_i32_1 = arith.constant 0 : i32
    return %c0_i32, %c0_i32_0 : i32, i32
  }
  func.func @transform_5(%arg0: i32) -> (i32, i32) {
    %c0_i32 = arith.constant 0 : i32
    %c0_i32_0 = arith.constant 0 : i32
    %c0_i32_1 = arith.constant 0 : i32
    return %c0_i32, %c0_i32_0 : i32, i32
  }
  func.func @transform_6(%arg0: i32) -> (i32, i32) {
    %c0_i32 = arith.constant 0 : i32
    %c0_i32_0 = arith.constant 0 : i32
    return %arg0, %c0_i32 : i32, i32
  }
}

</mosaic_0001>

<bundles_post_ra>
// kernel: tpu_custom_call.1
= control target key start
LH: loop header
LB: loop body
LE: loop exit
PB: predicated region body
PF: predicated region fallthrough
CT: control target
= control target key end

     0   :  { %v911_v1 = vmov 0.0   ;;  %vm912_vm0 = vmmov 0   ;;  %s1114_s0 = inlined_call_operand.vmem [shape: bf16[8,128], index: 0, kind: input, shape index: {}]   ;;  %s1115_s1 = inlined_call_operand.vmem [shape: bf16[2,128,32], index: 1, kind: input, shape index: {}]   ;;  %s1116_s2 = inlined_call_operand.vmem [shape: bf16[5,32,32], index: 2, kind: input, shape index: {}]   ;;  %s1117_s3 = inlined_call_operand.vmem [shape: f32[6,32], index: 3, kind: input, shape index: {}]   ;;  %s1118_s4 = inlined_call_operand.vmem [shape: bf16[32,128], index: 4, kind: input, shape index: {}]   ;;  %s1119_s5 = inlined_call_operand.vmem [shape: f32[1,8], index: 5, kind: input, shape index: {}]   ;;  %s1120_s6 = inlined_call_operand.hbm [shape: f32[8,8], index: 6, kind: output, shape index: {}]  }
   0x1   :  { %v861_v0 = vld [vmem:[%s1115_s1 + $0x38] sm:$0xff]   ;;  %770 = vmatprep.subr.bf16.mxu0 %v911_v1  ;;  %790 = vmatprep.subr.bf16.mxu1 %v911_v1  ;;  %v862_v2 = vld [vmem:[%s1115_s1 + $0x30] sm:$0xff]   ;;  %v863_v3 = vld [vmem:[%s1115_s1 + $0x28] sm:$0xff]  }
   0x2   :  { %771 = vmatpush3.bf16.msra.mxu0 %v861_v0  ;;  %786 = vmatprep.mubr.msk.bf16.mxu0 %vm912_vm0, %v911_v1  ;;  %v864_v4 = vld [vmem:[%s1115_s1 + $0x20] sm:$0xff]   ;;  %v865_v5 = vld [vmem:[%s1115_s1 + $0x18] sm:$0xff]   ;;  %v866_v6 = vld [vmem:[%s1115_s1 + $0x10] sm:$0xff]  }
   0x3   :  { %772 = vmatprep.subr.bf16.mxu0 %v911_v1  ;;  %794 = vmatprep.mubr.msk.bf16.mxu1 %vm912_vm0, %v911_v1  ;;  %v867_v7 = vld [vmem:[%s1115_s1 + $0x8] sm:$0xff]  }
   0x6   :  { %773 = vmatpush3.bf16.msra.mxu0 %v862_v2 }
   0x7   :  { %774 = vmatprep.subr.bf16.mxu0 %v911_v1 }
   0xa   :  { %775 = vmatpush3.bf16.msra.mxu0 %v863_v3 }
   0xb   :  { %776 = vmatprep.subr.bf16.mxu0 %v911_v1 }
   0xe   :  { %777 = vmatpush3.bf16.msra.mxu0 %v864_v4 }
   0xf   :  { %778 = vmatprep.subr.bf16.mxu0 %v911_v1 }
  0x12   :  { %779 = vmatpush3.bf16.msra.mxu0 %v865_v5 }
  0x13   :  { %780 = vmatprep.subr.bf16.mxu0 %v911_v1 }
  0x16   :  { %781 = vmatpush3.bf16.msra.mxu0 %v866_v6 }
  0x17   :  { %11 = vsyncpa [#allocation3], 0  ;;  %782 = vmatprep.subr.bf16.mxu0 %v911_v1  ;;  %v868_v8 = vld [vmem:[%s1115_s1] sm:$0xff]   ;;  %v869_v10 = vld [vmem:[%s1116_s2 + $0x8] sm:$0xff]   ;;  %vm158_vm1 = vcmask 261120   ;;  %s913_s17 = smov [#allocation2]  }
  0x18   :  { %v989_v9 = vld [vmem:[%s1114_s0] sm:$0xf]  ;;  %791 = vmatpush3.bf16.msra.mxu1 %v869_v10  ;;  %v871_v18 = vld [vmem:[%s1116_s2 + $0x18] sm:$0xff]   ;;  %v872_v21 = vld [vmem:[%s1116_s2 + $0x10] sm:$0xff]   ;;  %vm645_vm2 = vcmask 64512  }
  0x19   :  { %792 = vmatprep.subr.bf16.mxu1 %v911_v1  ;;  %v870_v11 = vld [vmem:[%s1116_s2] sm:$0xff]   ;;  %v873_v28 = vld [vmem:[%s1116_s2 + $0x28] sm:$0xff]   ;;  %v875_v38 = vld [vmem:[%s1115_s1 + $0x78] sm:$0xff]  }
  0x1a   :  { %783 = vmatpush3.bf16.msra.mxu0 %v867_v7  ;;  %v661_v12 = vld [vmem:[%s1117_s3] ss:$0 sm:$0xff]  ;;  %v670_v22 = vld [vmem:[%s1117_s3 + $0x1] ss:$0 sm:$0xff]  ;;  %v678_v32 = vld [vmem:[%s1117_s3 + $0x2] ss:$0 sm:$0xff] }
  0x1b   :  { %784 = vmatprep.subr.bf16.mxu0 %v911_v1  ;;  %v874_v31 = vld [vmem:[%s1116_s2 + $0x20] sm:$0xff]   ;;  %v876_v41 = vld [vmem:[%s1115_s1 + $0x70] sm:$0xff]   ;;  %v877_v42 = vld [vmem:[%s1115_s1 + $0x68] sm:$0xff]  }
  0x1c   :  { %793 = vmatpush3.bf16.msra.mxu1 %v870_v11  ;;  %v878_v43 = vld [vmem:[%s1115_s1 + $0x60] sm:$0xff]   ;;  %v879_v44 = vld [vmem:[%s1115_s1 + $0x58] sm:$0xff]   ;;  %v880_v45 = vld [vmem:[%s1115_s1 + $0x50] sm:$0xff]  }
  0x1d   :  { %798 = vmatprep.subr.bf16.mxu1 %v911_v1  ;;  %v881_v46 = vld [vmem:[%s1115_s1 + $0x48] sm:$0xff]   ;;  %v882_v47 = vld [vmem:[%s1115_s1 + $0x40] sm:$0xff]   ;;  %v883_v48 = vld [vmem:[%s1116_s2 + $0x38] sm:$0xff]  }
  0x1e   :  { %785 = vmatpush3.bf16.msra.mxu0 %v868_v8  ;;  %v884_v49 = vld [vmem:[%s1116_s2 + $0x30] sm:$0xff]   ;;  %v713_v55 = vld [vmem:[%s1117_s3 + $0x3] ss:$0 sm:$0xff]  ;;  %v885_v62 = vld [vmem:[%s1116_s2 + $0x48] sm:$0xff]  }
  0x1f   :  { %834 = vmatprep.subr.bf16.mxu0 %v911_v1  ;;  %v886_v0 = vld [vmem:[%s1116_s2 + $0x40] sm:$0xff]   ;;  %v887_v8 = vld [vmem:[%s1118_s4 + $0x8] sm:$0xff]  }
  0x20   :  { %v718_v2 = vld [vmem:[%s1117_s3 + $0x4] ss:$0 sm:$0xff] }
  0x21   :  { %787 = vmatmul.mubr.bf16.vlgmr.msra.gmra.mxu0 %v989_v9  ;;  %v888_v11 = vld [vmem:[%s1118_s4] sm:$0xff]   ;;  %s653_s4 = sshll.u32 %s913_s17, 4  ;;  %s654_s4 = int_to_ptr.vmem [resolvable:$true] %s653_s4 }
  0x22   :  { %838 = vmatprep.mubr.msk.bf16.mxu0 %vm912_vm0, %v911_v1  ;;  %835 = vmatpush3.bf16.msra.mxu0 %v883_v48  ;;  %p894_p1 = scmp.lt.s32.totalorder %s654_s4, %s654_s4 }
  0x23   :  { %836 = vmatprep.subr.bf16.mxu0 %v911_v1 }
  0x26   :  { %837 = vmatpush3.bf16.msra.mxu0 %v884_v49 }
  0x27   :  { %842 = vmatprep.subr.bf16.mxu0 %v911_v1 }
  0xe1   :  { %v129_v13 = vpop.f32.mrf.mxu0 }
  0xe2   :  { %v130_v14 = vadd.f32 %v661_v12, %v129_v13  ;;  %v726_v12 = vld [vmem:[%s1117_s3 + $0x5] ss:$0 sm:$0xff]  ;;  %s889_s3 = scalar_lea.vmem %s654_s4, 128 }
  0xe3   :  { %v788_v15 = vpop.f32.mrf.mxu0  ;;  %p890_p0 = scmp.ne.s32.totalorder %s654_s4, %s889_s3  ;;  %p895_p2 = scmp.lt.s32.totalorder %s889_s3, %s889_s3 }
  0xe4   :  { %v135_v16 = vmax.f32 %v130_v14, 0.0 }
  0xe5   :  { %v132_v17 = vpop.f32.mrf.mxu0  ;;  %p896_p3 = por %p895_p2, %p894_p1 }
  0xe6   :  { %v136_v19 = vpack.c.bf16 %v135_v16, %v135_v16 }
  0xe7   :  { %v789_v20 = vpop.f32.mrf.mxu0  ;;  %p897_p4 = pnand %p896_p3, %p890_p0 }
  0xe8   :  { %795 = vmatmul.mubr.msk.bf16.vlgmr.msra.gmra.mxu1 %vm158_vm1, %v136_v19 }
  0xe9   :  { %799 = vmatpush3.bf16.msra.mxu1 %v871_v18  ;;  %802 = vmatprep.mubr.msk.bf16.mxu1 %vm912_vm0, %v911_v1 }
  0xea   :  { %800 = vmatprep.subr.bf16.mxu1 %v911_v1 }
  0xed   :  { %801 = vmatpush3.bf16.msra.mxu1 %v872_v21 }
  0xee   :  { %806 = vmatprep.subr.bf16.mxu1 %v911_v1 }
 0x1a8   :  { %v196_v23 = vpop.f32.mrf.mxu1 }
 0x1a9   :  { %v197_v24 = vadd.f32 %v670_v22, %v196_v23 }
 0x1aa   :  { %v796_v25 = vpop.f32.mrf.mxu1 }
 0x1ab   :  { %v202_v26 = vmax.f32 %v197_v24, 0.0 }
 0x1ac   :  { %v199_v27 = vpop.f32.mrf.mxu1 }
 0x1ad   :  { %v203_v29 = vpack.c.bf16 %v202_v26, %v202_v26 }
 0x1ae   :  { %v797_v30 = vpop.f32.mrf.mxu1 }
 0x1af   :  { %803 = vmatmul.mubr.msk.bf16.vlgmr.msra.gmra.mxu1 %vm158_vm1, %v203_v29 }
 0x1b0   :  { %807 = vmatpush3.bf16.msra.mxu1 %v873_v28  ;;  %810 = vmatprep.mubr.msk.bf16.mxu1 %vm912_vm0, %v911_v1 }
 0x1b1   :  { %808 = vmatprep.subr.bf16.mxu1 %v911_v1 }
 0x1b4   :  { %809 = vmatpush3.bf16.msra.mxu1 %v874_v31 }
 0x1b5   :  { %814 = vmatprep.subr.bf16.mxu1 %v911_v1 }
 0x26f   :  { %v263_v33 = vpop.f32.mrf.mxu1 }
 0x270   :  { %v264_v34 = vadd.f32 %v678_v32, %v263_v33 }
 0x271   :  { %v804_v35 = vpop.f32.mrf.mxu1 }
 0x272   :  { %v269_v36 = vmax.f32 %v264_v34, 0.0 }
 0x273   :  { %v266_v37 = vpop.f32.mrf.mxu1 }
 0x274   :  { %v287_v39 = vpack.c.bf16 %v269_v36, %v269_v36 }
 0x275   :  { %v805_v40 = vpop.f32.mrf.mxu1 }
 0x276   :  { %811 = vmatmul.mubr.msk.bf16.vlgmr.msra.gmra.mxu1 %vm158_vm1, %v287_v39 }
 0x277   :  { %815 = vmatpush3.bf16.msra.mxu1 %v875_v38  ;;  %830 = vmatprep.mubr.msk.bf16.mxu1 %vm912_vm0, %v911_v1 }
 0x278   :  { %816 = vmatprep.subr.bf16.mxu1 %v911_v1 }
 0x27b   :  { %817 = vmatpush3.bf16.msra.mxu1 %v876_v41 }
 0x27c   :  { %818 = vmatprep.subr.bf16.mxu1 %v911_v1 }
 0x27f   :  { %819 = vmatpush3.bf16.msra.mxu1 %v877_v42 }
 0x280   :  { %820 = vmatprep.subr.bf16.mxu1 %v911_v1 }
 0x283   :  { %821 = vmatpush3.bf16.msra.mxu1 %v878_v43 }
 0x284   :  { %822 = vmatprep.subr.bf16.mxu1 %v911_v1 }
 0x287   :  { %823 = vmatpush3.bf16.msra.mxu1 %v879_v44 }
 0x288   :  { %824 = vmatprep.subr.bf16.mxu1 %v911_v1 }
 0x28b   :  { %825 = vmatpush3.bf16.msra.mxu1 %v880_v45 }
 0x28c   :  { %826 = vmatprep.subr.bf16.mxu1 %v911_v1 }
 0x28f   :  { %827 = vmatpush3.bf16.msra.mxu1 %v881_v46 }
 0x290   :  { %828 = vmatprep.subr.bf16.mxu1 %v911_v1 }
 0x293   :  { %829 = vmatpush3.bf16.msra.mxu1 %v882_v47 }
 0x296   :  { %831 = vmatmul.mubr.bf16.vlgmr.msra.gmra.mxu1 %v989_v9 }
 0x336   :  { %v342_v50 = vpop.f32.mrf.mxu1 }
 0x338   :  { %v812_v51 = vpop.f32.mrf.mxu1 }
 0x33a   :  { %v345_v52 = vpop.f32.mrf.mxu1 }
 0x33c   :  { %v813_v53 = vpop.f32.mrf.mxu1 }
 0x356   :  { %v430_v54 = vpop.f32.mrf.mxu1 }
 0x357   :  { %v431_v56 = vadd.f32 %v430_v54, %v342_v50 }
 0x358   :  { %v832_v57 = vpop.f32.mrf.mxu1 }
 0x359   :  { %v441_v58 = vadd.f32 %v713_v55, %v431_v56 }
 0x35a   :  { %v433_v59 = vpop.f32.mrf.mxu1 }
 0x35b   :  { %v442_v60 = vmax.f32 %v441_v58, 0.0 }
 0x35c   :  { %v833_v61 = vpop.f32.mrf.mxu1 }
 0x35d   :  { %v443_v63 = vpack.c.bf16 %v442_v60, %v442_v60 }
 0x35f   :  { %839 = vmatmul.mubr.msk.bf16.vlgmr.msra.gmra.mxu0 %vm158_vm1, %v443_v63 }
 0x360   :  { %843 = vmatpush3.bf16.msra.mxu0 %v885_v62  ;;  %846 = vmatprep.mubr.msk.bf16.mxu0 %vm912_vm0, %v911_v1 }
 0x361   :  { %844 = vmatprep.subr.bf16.mxu0 %v911_v1 }
 0x364   :  { %845 = vmatpush3.bf16.msra.mxu0 %v886_v0 }
 0x365   :  { %850 = vmatprep.subr.bf16.mxu0 %v911_v1 }
 0x41f   :  { %v503_v3 = vpop.f32.mrf.mxu0 }
 0x420   :  { %v504_v4 = vadd.f32 %v718_v2, %v503_v3 }
 0x421   :  { %v840_v5 = vpop.f32.mrf.mxu0 }
 0x422   :  { %v509_v6 = vmax.f32 %v504_v4, 0.0 }
 0x423   :  { %v506_v7 = vpop.f32.mrf.mxu0 }
 0x424   :  { %v510_v9 = vpack.c.bf16 %v509_v6, %v509_v6 }
 0x425   :  { %v841_v10 = vpop.f32.mrf.mxu0 }
 0x426   :  { %847 = vmatmul.mubr.msk.bf16.vlgmr.msra.gmra.mxu0 %vm158_vm1, %v510_v9 }
 0x427   :  { %851 = vmatpush3.bf16.msra.mxu0 %v887_v8  ;;  %854 = vmatprep.mubr.msk.bf16.mxu0 %vm912_vm0, %v911_v1 }
 0x428   :  { %852 = vmatprep.subr.bf16.mxu0 %v911_v1  ;;  %v733_v1 = vld [vmem:[%s1119_s5] ss:$0 sm:$0xff] }
 0x42b   :  { %853 = vmatpush3.bf16.msra.mxu0 %v888_v11 }
 0x4e6   :  { %v570_v13 = vpop.f32.mrf.mxu0 }
 0x4e7   :  { %v571_v14 = vadd.f32 %v726_v12, %v570_v13 }
 0x4e8   :  { %v848_v15 = vpop.f32.mrf.mxu0 }
 0x4e9   :  { %v576_v16 = vmax.f32 %v571_v14, 0.0 }
 0x4ea   :  { %v573_v17 = vpop.f32.mrf.mxu0 }
 0x4eb   :  { %v577_v18 = vpack.c.bf16 %v576_v16, %v576_v16 }
 0x4ec   :  { %v849_v19 = vpop.f32.mrf.mxu0 }
 0x4ed   :  { %855 = vmatmul.mubr.msk.bf16.vlgmr.msra.gmra.mxu0 %vm158_vm1, %v577_v18 }
 0x5ad   :  { %v631_v20 = vpop.f32.mrf.mxu0 }
 0x5ae   :  { %v644_v21 = vadd.f32 %v733_v1, %v631_v20 }
 0x5af   :  { %v856_v22 = vpop.f32.mrf.mxu0 }
 0x5b0   :  { %646 = vst.msk [vmem:[#allocation2] sm:$0xff] %vm645_vm2, %v644_v21 }
 0x5b1   :  { %v634_v23 = vpop.f32.mrf.mxu0 }
 0x5b2   :  { %900 = shalt.err (!%p897_p4)
}
 0x5b3   :  { %656 = dma.vmem_to_hbm [thread:$0]  %s654_s4, 128, %s1120_s6, [#allocation3]   ;;  %v857_v24 = vpop.f32.mrf.mxu0 }
 0x5b4   :  { %909 = dma.done.wait [#allocation3], 128  }
 0x5b5   :  { %910 = vsyncadd [#allocation3], 4294967168 }
 0x5b6   :  { %660 = vsyncpa [#allocation3], 1 }

</bundles_post_ra>
